<compile_context>
chip_gen: v7x
topology: tpu7x:2x2x1
jax: 0.10.0
libtpu: 0.0.40
codegen_flags: <defaults>
</compile_context>

<pallas_src>
import functools

import jax
import jax.numpy as jnp
from jax.experimental import pallas as pl
from jax.experimental.pallas import tpu as pltpu

SELU_ALPHA = 1.6732632423543772
SELU_SCALE = 1.0507009873554805

LANE = 128
HIDDEN = 64


def _round_up(n, m):
    return (n + m - 1) // m * m


def _selu(x):
    # scale * elu(x, alpha); clamp exp arg so the unselected branch can't overflow.
    return SELU_SCALE * jnp.where(
        x > 0, x, SELU_ALPHA * (jnp.exp(jnp.minimum(x, 0.0)) - 1.0)
    )


def es_forward_kernel(x_ref, w1_ref, b1_ref, w2_ref, b2_ref, w3_ref, b3_ref,
                      out_ref):
    """One batch tile: fused 3-layer MLP. Matmuls in compute dtype, math in f32."""
    x = x_ref[...]                                            # (TB, IN_PAD)

    # linear1 + SELU (accumulate in f32 on the MXU, SELU in f32 on VPU/EUP)
    h1 = jnp.dot(x, w1_ref[...], preferred_element_type=jnp.float32)
    h1 = _selu(h1 + b1_ref[...])                              # (TB, H_PAD) f32
    h1 = h1.astype(w2_ref.dtype)

    # linear2 + SELU
    h2 = jnp.dot(h1, w2_ref[...], preferred_element_type=jnp.float32)
    h2 = _selu(h2 + b2_ref[...])
    h2 = h2.astype(w3_ref.dtype)

    # actor_linear (no activation)
    out = jnp.dot(h2, w3_ref[...], preferred_element_type=jnp.float32)
    out_ref[...] = (out + b3_ref[...]).astype(out_ref.dtype)  # (TB, OUT_PAD)


def prepare_params(params, compute_dtype=jnp.float32):
    """One-time prep: transpose to (in, out), zero-pad to 128 lanes, cast.

    params: PyTorch-layout dict {w1:(64,in), b1:(64,), w2:(64,64), b2:(64,),
                                 w3:(out,64), b3:(out,)}
    """
    num_inputs = params["w1"].shape[1]
    num_outputs = params["w3"].shape[0]
    in_pad = _round_up(num_inputs, LANE)
    h_pad = _round_up(HIDDEN, LANE)
    out_pad = _round_up(num_outputs, LANE)

    def pad2(a, rows, cols):
        return jnp.pad(a, ((0, rows - a.shape[0]), (0, cols - a.shape[1])))

    def pad_bias(b, cols):
        return jnp.pad(b, (0, cols - b.shape[0])).reshape(1, cols)

    return {
        "w1": pad2(params["w1"].T, in_pad, h_pad).astype(compute_dtype),
        "b1": pad_bias(params["b1"], h_pad).astype(jnp.float32),
        "w2": pad2(params["w2"].T, h_pad, h_pad).astype(compute_dtype),
        "b2": pad_bias(params["b2"], h_pad).astype(jnp.float32),
        "w3": pad2(params["w3"].T, h_pad, out_pad).astype(compute_dtype),
        "b3": pad_bias(params["b3"], out_pad).astype(jnp.float32),
    }


def es_forward(x, prep, num_outputs, tile_b=512):
    """x: (B, num_inputs) f32/bf16. prep: output of prepare_params."""
    B, num_inputs = x.shape
    in_pad = prep["w1"].shape[0]
    h_pad = prep["w1"].shape[1]
    out_pad = prep["w3"].shape[1]
    compute_dtype = prep["w1"].dtype
    dsize = jnp.dtype(compute_dtype).itemsize

    # Batch tile: multiple of 8 sublanes, capped so 2x(in+out) tiles + resident
    # weights fit comfortably in v7x's scoped VMEM.
    tb = min(tile_b, _round_up(max(B, 8), 8))
    b_pad = _round_up(B, tb)
    grid = (b_pad // tb,)

    # Pad batch rows and input lanes with zeros; cast activations to compute dtype.
    x_p = jnp.pad(x.astype(compute_dtype),
                  ((0, b_pad - B), (0, in_pad - num_inputs)))

    cost = pl.CostEstimate(
        flops=2 * b_pad * (in_pad * h_pad + h_pad * h_pad + h_pad * out_pad),
        transcendentals=2 * b_pad * h_pad,
        bytes_accessed=(b_pad * in_pad * dsize            # x stream in
                        + b_pad * out_pad * 4             # out stream (f32)
                        + (in_pad * h_pad + h_pad * h_pad
                           + h_pad * out_pad) * dsize     # resident weights
                        + (2 * h_pad + out_pad) * 4),     # biases
    )

    out_full = pl.pallas_call(
        es_forward_kernel,
        out_shape=jax.ShapeDtypeStruct((b_pad, out_pad), jnp.float32),
        grid=grid,
        in_specs=[
            pl.BlockSpec((tb, in_pad), lambda i: (i, 0)),     # x: batch-tiled
            pl.BlockSpec((in_pad, h_pad), lambda i: (0, 0)),  # w1: resident
            pl.BlockSpec((1, h_pad), lambda i: (0, 0)),       # b1
            pl.BlockSpec((h_pad, h_pad), lambda i: (0, 0)),   # w2
            pl.BlockSpec((1, h_pad), lambda i: (0, 0)),       # b2
            pl.BlockSpec((h_pad, out_pad), lambda i: (0, 0)), # w3
            pl.BlockSpec((1, out_pad), lambda i: (0, 0)),     # b3
        ],
        out_specs=pl.BlockSpec((tb, out_pad), lambda i: (i, 0)),
        compiler_params=pltpu.CompilerParams(
            dimension_semantics=("parallel",)),
        cost_estimate=cost,
    )(x_p, prep["w1"], prep["b1"], prep["w2"], prep["b2"],
      prep["w3"], prep["b3"])

    return out_full[:B, :num_outputs]


def init_params(key, num_inputs, num_outputs, hidden=HIDDEN):
    """Deterministic init mimicking nn.Linear default: U(-1/sqrt(fan_in), +)."""
    ks = jax.random.split(key, 6)

    def lin(kw, kb, fan_in, fan_out):
        bound = 1.0 / jnp.sqrt(jnp.float32(fan_in))
        w = jax.random.uniform(kw, (fan_out, fan_in), jnp.float32, -bound, bound)
        b = jax.random.uniform(kb, (fan_out,), jnp.float32, -bound, bound)
        return w, b

    w1, b1 = lin(ks[0], ks[1], num_inputs, hidden)
    w2, b2 = lin(ks[2], ks[3], hidden, hidden)
    w3, b3 = lin(ks[4], ks[5], hidden, num_outputs)
    return {"w1": w1, "b1": b1, "w2": w2, "b2": b2, "w3": w3, "b3": b3}


def es_forward_ref(x, p):
    """Pure-JAX reference reproducing the PyTorch forward exactly (f32)."""
    h1 = _selu(x @ p["w1"].T + p["b1"])
    h2 = _selu(h1 @ p["w2"].T + p["b2"])
    return h2 @ p["w3"].T + p["b3"]


if __name__ == "__main__":
    NUM_INPUTS, NUM_OUTPUTS = 32, 6   # e.g. action_space.n == 6

    key = jax.random.PRNGKey(0)
    k_x, k_p, k_x2 = jax.random.split(key, 3)
    params = init_params(k_p, NUM_INPUTS, NUM_OUTPUTS)

    jit_fwd = jax.jit(es_forward, static_argnames=("num_outputs", "tile_b"))

    # --- f32 path, tiny batch: exact-match check against the reference -------
    B = 8
    x = jax.random.normal(k_x, (B, NUM_INPUTS), jnp.float32)
    prep_f32 = prepare_params(params, compute_dtype=jnp.float32)
    out = jax.block_until_ready(jit_fwd(x, prep_f32, NUM_OUTPUTS))
    ref = es_forward_ref(x, params)
    assert out.shape == (B, NUM_OUTPUTS)
    assert jnp.allclose(out, ref, atol=1e-5, rtol=1e-5), "f32 mismatch vs reference"

    # --- bf16 matmul-input path (v6e/v7x HBM-traffic optimization), bigger B --
    B2 = 256
    x2 = jax.random.normal(k_x2, (B2, NUM_INPUTS), jnp.float32)
    prep_bf16 = prepare_params(params, compute_dtype=jnp.bfloat16)
    out_bf16 = jax.block_until_ready(jit_fwd(x2, prep_bf16, NUM_OUTPUTS))
    ref2 = es_forward_ref(x2, params)
    assert out_bf16.shape == (B2, NUM_OUTPUTS)
    assert jnp.allclose(out_bf16, ref2, atol=5e-2, rtol=5e-2), "bf16 mismatch vs reference"

    print("KERNEL_OK")
</pallas_src>

<mosaic_0001>
module attributes {stable_mosaic.version = 11 : i64} {
  func.func @es_forward_kernel(%arg0: i32, %arg1: memref<8x128xf32, #tpu.memory_space<vmem>>, %arg2: memref<128x128xf32, #tpu.memory_space<vmem>>, %arg3: memref<1x128xf32, #tpu.memory_space<vmem>>, %arg4: memref<128x128xf32, #tpu.memory_space<vmem>>, %arg5: memref<1x128xf32, #tpu.memory_space<vmem>>, %arg6: memref<128x128xf32, #tpu.memory_space<vmem>>, %arg7: memref<1x128xf32, #tpu.memory_space<vmem>>, %arg8: memref<8x128xf32, #tpu.memory_space<vmem>>) attributes {dimension_semantics = [#tpu.dimension_semantics<parallel>], iteration_bounds = array<i64: 1>, scalar_prefetch = 0 : i64, scratch_operands = 0 : i64, tpu.core_type = #tpu.core_type<tc>, window_params = [{transform_indices = @transform_0, window_bounds = array<i64: 8, 128>}, {pipeline_mode = #tpu.pipeline_mode<synchronous>, transform_indices = @transform_1, window_bounds = array<i64: 128, 128>}, {pipeline_mode = #tpu.pipeline_mode<synchronous>, transform_indices = @transform_2, window_bounds = array<i64: 1, 128>}, {pipeline_mode = #tpu.pipeline_mode<synchronous>, transform_indices = @transform_3, window_bounds = array<i64: 128, 128>}, {pipeline_mode = #tpu.pipeline_mode<synchronous>, transform_indices = @transform_4, window_bounds = array<i64: 1, 128>}, {pipeline_mode = #tpu.pipeline_mode<synchronous>, transform_indices = @transform_5, window_bounds = array<i64: 128, 128>}, {pipeline_mode = #tpu.pipeline_mode<synchronous>, transform_indices = @transform_6, window_bounds = array<i64: 1, 128>}, {transform_indices = @transform_7, window_bounds = array<i64: 8, 128>}]} {
    %c0 = arith.constant 0 : index
    %c0_0 = arith.constant 0 : index
    %0 = vector.load %arg1[%c0, %c0_0] : memref<8x128xf32, #tpu.memory_space<vmem>>, vector<8x128xf32>
    %c0_1 = arith.constant 0 : index
    %c0_2 = arith.constant 0 : index
    %1 = vector.load %arg2[%c0_1, %c0_2] : memref<128x128xf32, #tpu.memory_space<vmem>>, vector<128x128xf32>
    %cst = arith.constant dense<0.000000e+00> : vector<8x128xf32>
    %2 = tpu.matmul %0, %1, %cst {dimension_numbers = #tpu.dot_dimension_numbers<[1], [0], [0], [1], [0, 0, 1, 1], [], []>} : vector<8x128xf32>, vector<128x128xf32>, vector<8x128xf32> -> vector<8x128xf32>
    %c0_3 = arith.constant 0 : index
    %c0_4 = arith.constant 0 : index
    %3 = vector.load %arg3[%c0_3, %c0_4] : memref<1x128xf32, #tpu.memory_space<vmem>>, vector<1x128xf32>
    %4 = vector.broadcast %3 : vector<1x128xf32> to vector<8x128xf32>
    %5 = arith.addf %2, %4 : vector<8x128xf32>
    %cst_5 = arith.constant 0.000000e+00 : f32
    %6 = vector.broadcast %cst_5 : f32 to vector<8x128xf32>
    %7 = arith.cmpf ogt, %5, %6 : vector<8x128xf32>
    %cst_6 = arith.constant 0.000000e+00 : f32
    %8 = vector.broadcast %cst_6 : f32 to vector<8x128xf32>
    %9 = arith.minimumf %5, %8 : vector<8x128xf32>
    %10 = math.exp %9 : vector<8x128xf32>
    %cst_7 = arith.constant 1.000000e+00 : f32
    %11 = vector.broadcast %cst_7 : f32 to vector<8x128xf32>
    %12 = arith.subf %10, %11 : vector<8x128xf32>
    %cst_8 = arith.constant 1.67326319 : f32
    %13 = vector.broadcast %cst_8 : f32 to vector<8x128xf32>
    %14 = arith.mulf %13, %12 : vector<8x128xf32>
    %15 = arith.select %7, %5, %14 : vector<8x128xi1>, vector<8x128xf32>
    %cst_9 = arith.constant 1.05070102 : f32
    %16 = vector.broadcast %cst_9 : f32 to vector<8x128xf32>
    %17 = arith.mulf %16, %15 : vector<8x128xf32>
    %c0_10 = arith.constant 0 : index
    %c0_11 = arith.constant 0 : index
    %18 = vector.load %arg4[%c0_10, %c0_11] : memref<128x128xf32, #tpu.memory_space<vmem>>, vector<128x128xf32>
    %cst_12 = arith.constant dense<0.000000e+00> : vector<8x128xf32>
    %19 = tpu.matmul %17, %18, %cst_12 {dimension_numbers = #tpu.dot_dimension_numbers<[1], [0], [0], [1], [0, 0, 1, 1], [], []>} : vector<8x128xf32>, vector<128x128xf32>, vector<8x128xf32> -> vector<8x128xf32>
    %c0_13 = arith.constant 0 : index
    %c0_14 = arith.constant 0 : index
    %20 = vector.load %arg5[%c0_13, %c0_14] : memref<1x128xf32, #tpu.memory_space<vmem>>, vector<1x128xf32>
    %21 = vector.broadcast %20 : vector<1x128xf32> to vector<8x128xf32>
    %22 = arith.addf %19, %21 : vector<8x128xf32>
    %cst_15 = arith.constant 0.000000e+00 : f32
    %23 = vector.broadcast %cst_15 : f32 to vector<8x128xf32>
    %24 = arith.cmpf ogt, %22, %23 : vector<8x128xf32>
    %cst_16 = arith.constant 0.000000e+00 : f32
    %25 = vector.broadcast %cst_16 : f32 to vector<8x128xf32>
    %26 = arith.minimumf %22, %25 : vector<8x128xf32>
    %27 = math.exp %26 : vector<8x128xf32>
    %cst_17 = arith.constant 1.000000e+00 : f32
    %28 = vector.broadcast %cst_17 : f32 to vector<8x128xf32>
    %29 = arith.subf %27, %28 : vector<8x128xf32>
    %cst_18 = arith.constant 1.67326319 : f32
    %30 = vector.broadcast %cst_18 : f32 to vector<8x128xf32>
    %31 = arith.mulf %30, %29 : vector<8x128xf32>
    %32 = arith.select %24, %22, %31 : vector<8x128xi1>, vector<8x128xf32>
    %cst_19 = arith.constant 1.05070102 : f32
    %33 = vector.broadcast %cst_19 : f32 to vector<8x128xf32>
    %34 = arith.mulf %33, %32 : vector<8x128xf32>
    %c0_20 = arith.constant 0 : index
    %c0_21 = arith.constant 0 : index
    %35 = vector.load %arg6[%c0_20, %c0_21] : memref<128x128xf32, #tpu.memory_space<vmem>>, vector<128x128xf32>
    %cst_22 = arith.constant dense<0.000000e+00> : vector<8x128xf32>
    %36 = tpu.matmul %34, %35, %cst_22 {dimension_numbers = #tpu.dot_dimension_numbers<[1], [0], [0], [1], [0, 0, 1, 1], [], []>} : vector<8x128xf32>, vector<128x128xf32>, vector<8x128xf32> -> vector<8x128xf32>
    %c0_23 = arith.constant 0 : index
    %c0_24 = arith.constant 0 : index
    %37 = vector.load %arg7[%c0_23, %c0_24] : memref<1x128xf32, #tpu.memory_space<vmem>>, vector<1x128xf32>
    %38 = vector.broadcast %37 : vector<1x128xf32> to vector<8x128xf32>
    %39 = arith.addf %36, %38 : vector<8x128xf32>
    %c0_25 = arith.constant 0 : index
    %c0_26 = arith.constant 0 : index
    %40 = vector.load %arg8[%c0_25, %c0_26] : memref<8x128xf32, #tpu.memory_space<vmem>>, vector<8x128xf32>
    tpu.vector_store %arg8[%c0_25, %c0_26], %39 {strides = array<i32>} : memref<8x128xf32, #tpu.memory_space<vmem>>, vector<8x128xf32>,
    return
  }
  func.func @transform_0(%arg0: i32) -> (i32, i32) {
    %c0_i32 = arith.constant 0 : i32
    %c0_i32_0 = arith.constant 0 : i32
    return %arg0, %c0_i32 : i32, i32
  }
  func.func @transform_1(%arg0: i32) -> (i32, i32) {
    %c0_i32 = arith.constant 0 : i32
    %c0_i32_0 = arith.constant 0 : i32
    %c0_i32_1 = arith.constant 0 : i32
    return %c0_i32, %c0_i32_0 : i32, i32
  }
  func.func @transform_2(%arg0: i32) -> (i32, i32) {
    %c0_i32 = arith.constant 0 : i32
    %c0_i32_0 = arith.constant 0 : i32
    %c0_i32_1 = arith.constant 0 : i32
    return %c0_i32, %c0_i32_0 : i32, i32
  }
  func.func @transform_3(%arg0: i32) -> (i32, i32) {
    %c0_i32 = arith.constant 0 : i32
    %c0_i32_0 = arith.constant 0 : i32
    %c0_i32_1 = arith.constant 0 : i32
    return %c0_i32, %c0_i32_0 : i32, i32
  }
  func.func @transform_4(%arg0: i32) -> (i32, i32) {
    %c0_i32 = arith.constant 0 : i32
    %c0_i32_0 = arith.constant 0 : i32
    %c0_i32_1 = arith.constant 0 : i32
    return %c0_i32, %c0_i32_0 : i32, i32
  }
  func.func @transform_5(%arg0: i32) -> (i32, i32) {
    %c0_i32 = arith.constant 0 : i32
    %c0_i32_0 = arith.constant 0 : i32
    %c0_i32_1 = arith.constant 0 : i32
    return %c0_i32, %c0_i32_0 : i32, i32
  }
  func.func @transform_6(%arg0: i32) -> (i32, i32) {
    %c0_i32 = arith.constant 0 : i32
    %c0_i32_0 = arith.constant 0 : i32
    %c0_i32_1 = arith.constant 0 : i32
    return %c0_i32, %c0_i32_0 : i32, i32
  }
  func.func @transform_7(%arg0: i32) -> (i32, i32) {
    %c0_i32 = arith.constant 0 : i32
    %c0_i32_0 = arith.constant 0 : i32
    return %arg0, %c0_i32 : i32, i32
  }
}

</mosaic_0001>

<bundles_post_ra>
// kernel: es_forward.1
= control target key start
LH: loop header
LB: loop body
LE: loop exit
PB: predicated region body
PF: predicated region fallthrough
CT: control target
= control target key end

     0   :  { %12 = vsyncpa [#allocation3], 0  ;;  %s873_s0 = inlined_call_operand.vmem [shape: f32[8,128], index: 0, kind: input, shape index: {}]   ;;  %s874_s1 = inlined_call_operand.hbm [shape: f32[128,128], index: 1, kind: input, shape index: {}]   ;;  %s875_s2 = inlined_call_operand.vmem [shape: f32[1,128], index: 2, kind: input, shape index: {}]   ;;  %s876_s3 = inlined_call_operand.hbm [shape: f32[128,128], index: 3, kind: input, shape index: {}]   ;;  %s877_s4 = inlined_call_operand.vmem [shape: f32[1,128], index: 4, kind: input, shape index: {}]   ;;  %s878_s5 = inlined_call_operand.hbm [shape: f32[128,128], index: 5, kind: input, shape index: {}]   ;;  %s879_s6 = inlined_call_operand.vmem [shape: f32[1,128], index: 6, kind: input, shape index: {}]   ;;  %s880_s7 = inlined_call_operand.hbm [shape: f32[8,128], index: 7, kind: output, shape index: {}]  }
   0x1   :  { %13 = vsyncpa [#allocation6], 0 }
   0x2   :  { %14 = vsyncpa [#allocation4], 0  ;;  %s721_s24 = smov [#allocation5]   ;;  %s722_s26 = smov [#allocation2]  }
   0x3   :  { %s36_s25 = sshll.u32 %s721_s24, 4  ;;  %s22_s27 = sshll.u32 %s722_s26, 4  ;;  %s37_s25 = int_to_ptr.vmem [resolvable:$true] %s36_s25  ;;  %s770_s27 = int_to_ptr.vmem [resolvable:$true] %s22_s27 }
   0x4   :  { %s627_s30 = scalar_lea.hbm %s876_s3, 2048 }
   0x5   :  { %p628_p0 = scmp.ne.s32.totalorder %s876_s3, %s627_s30  ;;  %p631_p1 = scmp.lt.u32.totalorder %s627_s30, %s876_s3 }
   0x7   :  { %p633_p2 = pnand %p631_p1, %p628_p0 }
   0x9   :  { %636 = shalt.err (!%p633_p2)
}
   0xa   :  { %s637_s12 = scalar_lea.vmem %s37_s25, 2048  ;;  %p642_p4 = scmp.lt.s32.totalorder %s37_s25, %s37_s25 }
   0xb   :  { %p638_p3 = scmp.ne.s32.totalorder %s37_s25, %s637_s12  ;;  %p643_p5 = scmp.lt.s32.totalorder %s637_s12, %s637_s12 }
   0xd   :  { %p644_p6 = por %p643_p5, %p642_p4 }
   0xf   :  { %p645_p7 = pnand %p644_p6, %p638_p3 }
  0x11   :  { %648 = shalt.err (!%p645_p7)
}
  0x12   :  { %s723_s13 = smov 128   ;;  %s724_s14 = smov 8  }
  0x13   :  { %42 = dma.hbm_to_vmem [thread:$0]  %s876_s3, 2048, %s37_s25, [#allocation6], %s723_s13, %s723_s13, %s724_s14  }
  0x14   :  { %s649_s19 = scalar_lea.hbm %s874_s1, 2048 }
  0x15   :  { %p650_p8 = scmp.ne.s32.totalorder %s874_s1, %s649_s19  ;;  %p653_p9 = scmp.lt.u32.totalorder %s649_s19, %s874_s1 }
  0x17   :  { %p655_p10 = pnand %p653_p9, %p650_p8 }
  0x19   :  { %658 = shalt.err (!%p655_p10)
}
  0x1a   :  { %s659_s24 = scalar_lea.vmem %s770_s27, 2048  ;;  %p664_p12 = scmp.lt.s32.totalorder %s770_s27, %s770_s27 }
  0x1b   :  { %p660_p11 = scmp.ne.s32.totalorder %s770_s27, %s659_s24  ;;  %p665_p13 = scmp.lt.s32.totalorder %s659_s24, %s659_s24 }
  0x1d   :  { %p666_p0 = por %p665_p13, %p664_p12 }
  0x1f   :  { %p667_p1 = pnand %p666_p0, %p660_p11 }
  0x21   :  { %670 = shalt.err (!%p667_p1)
}
  0x22   :  { %28 = dma.hbm_to_vmem [thread:$0]  %s874_s1, 2048, %s770_s27, [#allocation3], %s723_s13, %s723_s13, %s724_s14  }
  0x23   :  { %s725_s26 = smov [#allocation7]   ;;  %s671_s8 = scalar_lea.hbm %s878_s5, 2048 }
  0x24   :  { %s50_s28 = sshll.u32 %s725_s26, 4  ;;  %p672_p2 = scmp.ne.s32.totalorder %s878_s5, %s671_s8  ;;  %s51_s28 = int_to_ptr.vmem [resolvable:$true] %s50_s28 }
  0x25   :  { %p675_p3 = scmp.lt.u32.totalorder %s671_s8, %s878_s5 }
  0x27   :  { %p677_p4 = pnand %p675_p3, %p672_p2 }
  0x29   :  { %680 = shalt.err (!%p677_p4)
}
  0x2a   :  { %s681_s15 = scalar_lea.vmem %s51_s28, 2048  ;;  %p686_p6 = scmp.lt.s32.totalorder %s51_s28, %s51_s28 }
  0x2b   :  { %p682_p5 = scmp.ne.s32.totalorder %s51_s28, %s681_s15  ;;  %p687_p7 = scmp.lt.s32.totalorder %s681_s15, %s681_s15 }
  0x2d   :  { %p688_p8 = por %p687_p7, %p686_p6 }
  0x2f   :  { %p689_p9 = pnand %p688_p8, %p682_p5 }
  0x31   :  { %692 = shalt.err (!%p689_p9)
}
  0x32   :  { %56 = dma.hbm_to_vmem [thread:$0]  %s878_s5, 2048, %s51_s28, [#allocation6], %s723_s13, %s723_s13, %s724_s14  }
  0x33   :  { %715 = dma.done.wait [#allocation3], 2048  }
  0x34   :  { %716 = vsyncadd [#allocation3], 4294965248 }
  0x35   :  { %717 = dma.done.wait [#allocation6], 4096  }
  0x36   :  { %718 = vsyncadd [#allocation6], 4294963200  ;;  %v726_v0 = vmov 0.0|0.0   ;;  %vm727_vm0 = vmmov 0   ;;  %v728_v1 = vmov 0.0   ;;  %v69_v2 = vld [vmem:[#allocation2] sm:$0xff] }
  0x37   :  { %542 = vmatprep.subr.bf16.mxu0 %v726_v0  ;;  %469 = vmatprep.mubr.msk.f32.mxu0 %vm727_vm0, %v728_v1  ;;  %v70_v3 = vld [vmem:[#allocation2 + $0x8] sm:$0xff]  ;;  %v71_v4 = vld [vmem:[#allocation2 + $0x10] sm:$0xff]  ;;  %v72_v6 = vld [vmem:[#allocation2 + $0x18] sm:$0xff]  ;;  %s729_s19 = smov [#allocation8]  }
  0x38   :  { %566 = vmatprep.subr.bf16.mxu1 %v726_v0  ;;  %504 = vmatprep.mubr.msk.f32.mxu1 %vm727_vm0, %v728_v1  ;;  %v543_v5 = vpack.c.bf16 %v70_v3, %v69_v2  ;;  %v546_v7 = vpack.c.bf16 %v72_v6, %v71_v4  ;;  %v73_v8 = vld [vmem:[#allocation2 + $0x20] sm:$0xff]  ;;  %v74_v9 = vld [vmem:[#allocation2 + $0x28] sm:$0xff]  ;;  %v172_v12 = vld [vmem:[#allocation5 + $0x10] sm:$0xff]  ;;  %s371_s20 = sshll.u32 %s729_s19, 4  ;;  %s372_s20 = int_to_ptr.vmem [resolvable:$true] %s371_s20 }
  0x39   :  { %v170_v10 = vld [vmem:[#allocation5] sm:$0xff]  ;;  %v171_v11 = vld [vmem:[#allocation5 + $0x8] sm:$0xff]  ;;  %v173_v13 = vld [vmem:[#allocation5 + $0x18] sm:$0xff]  ;;  %v549_v14 = vpack.c.bf16 %v74_v9, %v73_v8  ;;  %p698_p11 = scmp.lt.s32.totalorder %s372_s20, %s372_s20 }
  0x3a   :  { %544 = vmatpush3.bf16.msra.mxu0 %v543_v5  ;;  %v567_v15 = vpack.c.bf16 %v171_v11, %v170_v10  ;;  %v75_v16 = vld [vmem:[#allocation2 + $0x30] sm:$0xff]  ;;  %v76_v17 = vld [vmem:[#allocation2 + $0x38] sm:$0xff]  ;;  %v570_v18 = vpack.c.bf16 %v173_v13, %v172_v12  ;;  %v77_v20 = vld [vmem:[#allocation2 + $0x40] sm:$0xff] }
  0x3b   :  { %545 = vmatprep.subr.bf16.mxu0 %v726_v0  ;;  %v552_v19 = vpack.c.bf16 %v76_v17, %v75_v16  ;;  %v78_v21 = vld [vmem:[#allocation2 + $0x48] sm:$0xff]  ;;  %v79_v23 = vld [vmem:[#allocation2 + $0x50] sm:$0xff]  ;;  %v80_v24 = vld [vmem:[#allocation2 + $0x58] sm:$0xff] }
  0x3c   :  { %568 = vmatpush3.bf16.msra.mxu1 %v567_v15  ;;  %v555_v22 = vpack.c.bf16 %v78_v21, %v77_v20  ;;  %v558_v25 = vpack.c.bf16 %v80_v24, %v79_v23  ;;  %v81_v26 = vld [vmem:[#allocation2 + $0x60] sm:$0xff]  ;;  %v82_v27 = vld [vmem:[#allocation2 + $0x68] sm:$0xff]  ;;  %v83_v29 = vld [vmem:[#allocation2 + $0x70] sm:$0xff] }
  0x3d   :  { %569 = vmatprep.subr.bf16.mxu1 %v726_v0  ;;  %v561_v28 = vpack.c.bf16 %v82_v27, %v81_v26  ;;  %v84_v30 = vld [vmem:[#allocation2 + $0x78] sm:$0xff]  ;;  %v68_v32 = vld [vmem:[%s873_s0] sm:$0xff]  ;;  %v175_v34 = vld [vmem:[#allocation5 + $0x28] sm:$0xff] }
  0x3e   :  { %547 = vmatpush3.bf16.msra.mxu0 %v546_v7  ;;  %v564_v31 = vpack.c.bf16 %v84_v30, %v83_v29  ;;  %v174_v33 = vld [vmem:[#allocation5 + $0x20] sm:$0xff]  ;;  %v176_v36 = vld [vmem:[#allocation5 + $0x30] sm:$0xff]  ;;  %v177_v37 = vld [vmem:[#allocation5 + $0x38] sm:$0xff] }
  0x3f   :  { %548 = vmatprep.subr.bf16.mxu0 %v726_v0  ;;  %v573_v35 = vpack.c.bf16 %v175_v34, %v174_v33  ;;  %v576_v38 = vpack.c.bf16 %v177_v37, %v176_v36  ;;  %v178_v39 = vld [vmem:[#allocation5 + $0x40] sm:$0xff]  ;;  %v179_v40 = vld [vmem:[#allocation5 + $0x48] sm:$0xff]  ;;  %v180_v42 = vld [vmem:[#allocation5 + $0x50] sm:$0xff] }
  0x40   :  { %571 = vmatpush3.bf16.msra.mxu1 %v570_v18  ;;  %v579_v41 = vpack.c.bf16 %v179_v40, %v178_v39  ;;  %v181_v43 = vld [vmem:[#allocation5 + $0x58] sm:$0xff]  ;;  %v182_v45 = vld [vmem:[#allocation5 + $0x60] sm:$0xff]  ;;  %v183_v46 = vld [vmem:[#allocation5 + $0x68] sm:$0xff] }
  0x41   :  { %572 = vmatprep.subr.bf16.mxu1 %v726_v0  ;;  %v582_v44 = vpack.c.bf16 %v181_v43, %v180_v42  ;;  %v585_v47 = vpack.c.bf16 %v183_v46, %v182_v45  ;;  %v184_v48 = vld [vmem:[#allocation5 + $0x70] sm:$0xff]  ;;  %v185_v49 = vld [vmem:[#allocation5 + $0x78] sm:$0xff]  ;;  %v271_v51 = vld [vmem:[#allocation7] sm:$0xff] }
  0x42   :  { %550 = vmatpush3.bf16.msra.mxu0 %v549_v14  ;;  %v588_v50 = vpack.c.bf16 %v185_v49, %v184_v48  ;;  %v272_v52 = vld [vmem:[#allocation7 + $0x8] sm:$0xff]  ;;  %v273_v53 = vld [vmem:[#allocation7 + $0x10] sm:$0xff]  ;;  %v274_v55 = vld [vmem:[#allocation7 + $0x18] sm:$0xff] }
  0x43   :  { %551 = vmatprep.subr.bf16.mxu0 %v726_v0  ;;  %v591_v54 = vpack.c.bf16 %v272_v52, %v271_v51  ;;  %v594_v56 = vpack.c.bf16 %v274_v55, %v273_v53  ;;  %v381_v57 = vld [vmem:[%s875_s2] ss:$0 sm:$0xff]  ;;  %v276_v6 = vld [vmem:[#allocation7 + $0x28] sm:$0xff]  ;;  %v277_v8 = vld [vmem:[#allocation7 + $0x30] sm:$0xff] }
  0x44   :  { %574 = vmatpush3.bf16.msra.mxu1 %v573_v35  ;;  %v275_v5 = vld [vmem:[#allocation7 + $0x20] sm:$0xff]  ;;  %v278_v9 = vld [vmem:[#allocation7 + $0x38] sm:$0xff]  ;;  %v280_v12 = vld [vmem:[#allocation7 + $0x48] sm:$0xff] }
  0x45   :  { %575 = vmatprep.subr.bf16.mxu1 %v726_v0  ;;  %v597_v7 = vpack.c.bf16 %v276_v6, %v275_v5  ;;  %v600_v10 = vpack.c.bf16 %v278_v9, %v277_v8  ;;  %v279_v11 = vld [vmem:[#allocation7 + $0x40] sm:$0xff]  ;;  %v281_v14 = vld [vmem:[#allocation7 + $0x50] sm:$0xff]  ;;  %v282_v15 = vld [vmem:[#allocation7 + $0x58] sm:$0xff] }
  0x46   :  { %553 = vmatpush3.bf16.msra.mxu0 %v552_v19  ;;  %v603_v13 = vpack.c.bf16 %v280_v12, %v279_v11  ;;  %v606_v16 = vpack.c.bf16 %v282_v15, %v281_v14  ;;  %v283_v17 = vld [vmem:[#allocation7 + $0x60] sm:$0xff]  ;;  %v284_v18 = vld [vmem:[#allocation7 + $0x68] sm:$0xff]  ;;  %v285_v20 = vld [vmem:[#allocation7 + $0x70] sm:$0xff] }
  0x47   :  { %554 = vmatprep.subr.bf16.mxu0 %v726_v0  ;;  %v609_v19 = vpack.c.bf16 %v284_v18, %v283_v17  ;;  %v286_v21 = vld [vmem:[#allocation7 + $0x78] sm:$0xff]  ;;  %v383_v23 = vld [vmem:[%s877_s4] ss:$0 sm:$0xff]  ;;  %s693_s4 = scalar_lea.vmem %s372_s20, 128 }
  0x48   :  { %577 = vmatpush3.bf16.msra.mxu1 %v576_v38  ;;  %v385_v33 = vld [vmem:[%s879_s6] ss:$0 sm:$0xff]  ;;  %p694_p10 = scmp.ne.s32.totalorder %s372_s20, %s693_s4  ;;  %p699_p12 = scmp.lt.s32.totalorder %s693_s4, %s693_s4 }
  0x49   :  { %578 = vmatprep.subr.bf16.mxu1 %v726_v0 }
  0x4a   :  { %556 = vmatpush3.bf16.msra.mxu0 %v555_v22  ;;  %v612_v22 = vpack.c.bf16 %v286_v21, %v285_v20  ;;  %p700_p13 = por %p699_p12, %p698_p11 }
  0x4b   :  { %557 = vmatprep.subr.bf16.mxu0 %v726_v0 }
  0x4c   :  { %580 = vmatpush3.bf16.msra.mxu1 %v579_v41  ;;  %p701_p0 = pnand %p700_p13, %p694_p10 }
  0x4d   :  { %581 = vmatprep.subr.bf16.mxu1 %v726_v0 }
  0x4e   :  { %559 = vmatpush3.bf16.msra.mxu0 %v558_v25 }
  0x4f   :  { %560 = vmatprep.subr.bf16.mxu0 %v726_v0 }
  0x50   :  { %583 = vmatpush3.bf16.msra.mxu1 %v582_v44 }
  0x51   :  { %584 = vmatprep.subr.bf16.mxu1 %v726_v0 }
  0x52   :  { %562 = vmatpush3.bf16.msra.mxu0 %v561_v28 }
  0x53   :  { %563 = vmatprep.subr.bf16.mxu0 %v726_v0 }
  0x54   :  { %586 = vmatpush3.bf16.msra.mxu1 %v585_v47 }
  0x55   :  { %587 = vmatprep.subr.bf16.mxu1 %v726_v0 }
  0x56   :  { %565 = vmatpush3.bf16.msra.mxu0 %v564_v31 }
  0x57   :  { %590 = vmatprep.subr.bf16.mxu0 %v726_v0 }
  0x58   :  { %589 = vmatpush3.bf16.msra.mxu1 %v588_v50 }
  0x59   :  { %470 = vmatmul.mubr.f32.vlgmr.msra.gmra.mrb[0].mxu0 %v68_v32 }
  0x5a   :  { %539 = vmatprep.mubr.msk.f32.mxu0 %vm727_vm0, %v728_v1  ;;  %592 = vmatpush3.bf16.msra.mxu0 %v591_v54 }
  0x5b   :  { %593 = vmatprep.subr.bf16.mxu0 %v726_v0 }
  0x5e   :  { %595 = vmatpush3.bf16.msra.mxu0 %v594_v56 }
  0x5f   :  { %596 = vmatprep.subr.bf16.mxu0 %v726_v0 }
  0x62   :  { %598 = vmatpush3.bf16.msra.mxu0 %v597_v7 }
  0x63   :  { %599 = vmatprep.subr.bf16.mxu0 %v726_v0 }
  0x66   :  { %601 = vmatpush3.bf16.msra.mxu0 %v600_v10 }
  0x67   :  { %602 = vmatprep.subr.bf16.mxu0 %v726_v0 }
  0x6a   :  { %604 = vmatpush3.bf16.msra.mxu0 %v603_v13 }
  0x6b   :  { %605 = vmatprep.subr.bf16.mxu0 %v726_v0 }
  0x6e   :  { %607 = vmatpush3.bf16.msra.mxu0 %v606_v16 }
  0x6f   :  { %608 = vmatprep.subr.bf16.mxu0 %v726_v0 }
  0x72   :  { %610 = vmatpush3.bf16.msra.mxu0 %v609_v19 }
  0x73   :  { %611 = vmatprep.subr.bf16.mxu0 %v726_v0 }
  0x76   :  { %613 = vmatpush3.bf16.msra.mxu0 %v612_v22 }
 0x12c   :  { %v158_v58 = vpop.f32.mrb[0].mxu0 }
 0x12d   :  { %v159_v59 = vadd.f32 %v381_v57, %v158_v58  ;;  %v471_v60 = vpop.f32.mrb[1].mxu0 }
 0x12f   :  { %v163_v61 = vmin.f32 %v159_v59, 0.0  ;;  %vm162_vm1 = vcmp.gt.f32.partialorder %v159_v59, 0.0 }
 0x131   :  { %v164_v62 = vmul.f32 1.442695, %v163_v61 }
 0x133   :  { %623 = vpow2.f32 %v164_v62 }
 0x13d   :  { %v624_v63 = vpop.eup %623 }
 0x13e   :  { %v382_v1 = vadd.f32 -1.0, %v624_v63 }
 0x140   :  { %v167_v2 = vmul.f32 1.6732632, %v382_v1 }
 0x142   :  { %v168_v3 = vsel %vm162_vm1, %v159_v59, %v167_v2 }
 0x143   :  { %v169_v4 = vmul.f32 1.050701, %v168_v3 }
 0x145   :  { %505 = vmatmul.mubr.f32.vlgmr.msra.gmra.mrb[0].mxu1 %v169_v4 }
 0x218   :  { %v259_v24 = vpop.f32.mrb[0].mxu1 }
 0x219   :  { %v260_v25 = vadd.f32 %v383_v23, %v259_v24  ;;  %v506_v26 = vpop.f32.mrb[1].mxu1 }
 0x21b   :  { %v264_v27 = vmin.f32 %v260_v25, 0.0  ;;  %vm263_vm2 = vcmp.gt.f32.partialorder %v260_v25, 0.0 }
 0x21d   :  { %v265_v28 = vmul.f32 1.442695, %v264_v27 }
 0x21f   :  { %625 = vpow2.f32 %v265_v28 }
 0x229   :  { %v626_v29 = vpop.eup %625 }
 0x22a   :  { %v384_v30 = vadd.f32 -1.0, %v626_v29 }
 0x22c   :  { %v268_v31 = vmul.f32 1.6732632, %v384_v30 }
 0x22e   :  { %v269_v32 = vsel %vm263_vm2, %v260_v25, %v268_v31 }
 0x22f   :  { %v270_v0 = vmul.f32 1.050701, %v269_v32 }
 0x231   :  { %540 = vmatmul.mubr.f32.vlgmr.msra.gmra.mrb[2].mxu0 %v270_v0 }
 0x304   :  { %v360_v34 = vpop.f32.mrb[2].mxu0 }
 0x305   :  { %v361_v35 = vadd.f32 %v385_v33, %v360_v34  ;;  %v541_v36 = vpop.f32.mrb[3].mxu0 }
 0x307   :  { %364 = vst [vmem:[#allocation8] sm:$0xff] %v361_v35 }
 0x308   :  { %704 = shalt.err (!%p701_p0)
}
 0x309   :  { %s705_s23 = scalar_lea.hbm %s880_s7, 128 }
 0x30a   :  { %p706_p1 = scmp.ne.s32.totalorder %s880_s7, %s705_s23  ;;  %p709_p2 = scmp.lt.u32.totalorder %s705_s23, %s880_s7 }
 0x30c   :  { %p711_p3 = pnand %p709_p2, %p706_p1 }
 0x30e   :  { %714 = shalt.err (!%p711_p3)
}
 0x30f   :  { %374 = dma.vmem_to_hbm [thread:$0]  %s372_s20, 128, %s880_s7, [#allocation4]  }
 0x310   :  { %719 = dma.done.wait [#allocation4], 128  }
 0x311   :  { %720 = vsyncadd [#allocation4], 4294967168 }
 0x312   :  { %378 = vsyncpa [#allocation3], 1 }
 0x313   :  { %379 = vsyncpa [#allocation6], 1 }
 0x314   :  { %380 = vsyncpa [#allocation4], 1 }

</bundles_post_ra>
